<compile_context>
chip_gen: v7x
topology: tpu7x:2x2x1
jax: 0.10.0
libtpu: 0.0.40
codegen_flags: <defaults>
</compile_context>

<pallas_src>
import functools
import math

import jax
import jax.numpy as jnp
from jax.experimental import pallas as pl
from jax.experimental.pallas import tpu as pltpu


def _round_up(x, m):
    return ((x + m - 1) // m) * m


def _sublane_multiple(dtype):
    # 8 sublanes for 4-byte dtypes, 16 for bf16/f16, 32 for int8/fp8.
    return max(8, 32 // jnp.dtype(dtype).itemsize)


def _tpu_resources():
    """(physical VMEM bytes, TensorCores per chip) with conservative fallbacks."""
    vmem_bytes = 64 * 1024 * 1024          # v7x-safe default
    cores = 1                              # v5e/v6e-safe default
    try:
        info = pltpu.get_tpu_info()
        vmem_bytes = int(getattr(info, "vmem_capacity_bytes", vmem_bytes))
        for name in ("num_cores", "core_count", "num_tensorcores",
                     "tensorcore_count", "cores_per_chip"):
            val = getattr(info, name, None)
            if val:
                cores = int(val)
                break
    except Exception:
        pass
    return vmem_bytes, max(1, cores)


def _fold_seq_into_lanes(S, F):
    """Fold a factor r of S into the lane dim so the last dim is 128-aligned.

    (B, S, F) -> (B, S//r, r*F) is a contiguous (free) reshape; the kernel's
    per-fold partial means are summed back over r in the wrapper.  Falls back
    to r=1 when F is already lane-aligned or S % r != 0.
    """
    if F % 128 == 0:
        return 1, S, F
    r = 128 // math.gcd(F, 128)
    if r > 1 and S % r == 0:
        return r, S // r, r * F
    # TODO(synk): when F % 128 != 0 and S % r != 0 the last dim stays lane-
    # masked; a wrapper-side pad of F to a 128 multiple would restore density.
    return 1, S, F


def _plan_tiles(B, S_eff, F_eff, dtype, budget_bytes, cores):
    """Pick (tb, sc) with padding-aware VMEM accounting and (8,128) legality."""
    itemsize = jnp.dtype(dtype).itemsize
    sub_in = _sublane_multiple(dtype)
    lane_f = _round_up(F_eff, 128)

    def tile_bytes(tb, sc):
        # Physical VMEM footprint of one (tb, sc, F_eff) input tile.
        return tb * _round_up(sc, sub_in) * lane_f * itemsize

    # --- batch tile: full batch (always legal) or a multiple of 8 -----------
    if B <= 8:
        tb = B
    else:
        # Largest multiple of 8 rows for which even a minimal S-chunk fits.
        sc_min = min(S_eff, sub_in)
        cap = budget_bytes // max(1, tile_bytes(1, sc_min))
        tb = max(8, (cap // 8) * 8)
        tb = min(tb, max(8, (B // 8) * 8))

        # Multi-TensorCore chips (v7x): aim for >= 2 batch blocks per core on
        # the "parallel" axis, but keep blocks sublane-aligned and >= ~1 MiB.
        if cores > 1:
            want_blocks = 2 * cores
            if -(-B // tb) < want_blocks:
                per_row_full = max(1, tile_bytes(1, S_eff))
                rows_1mb = max(1, -(-(1 << 20) // per_row_full))
                floor_tb = min(tb, max(8, _round_up(rows_1mb, 8)))
                split_tb = max(8, ((-(-B // want_blocks)) // 8) * 8)
                tb = max(floor_tb, min(tb, split_tb))

    # --- sequence chunk ------------------------------------------------------
    max_pad_rows = budget_bytes // max(1, tb * lane_f * itemsize)
    if max_pad_rows >= _round_up(S_eff, sub_in):
        sc = S_eff                                  # whole sequence per tile
    else:
        sc = max(sub_in, (max_pad_rows // sub_in) * sub_in)
        sc = min(sc, S_eff)

    return tb, sc, tile_bytes(tb, sc)


def _mean_kernel(seq_ref, out_ref, acc_ref, *, inv_len, sc, s_total, mask_tail):
    # seq_ref block: (TB, SC, Fe) ; out_ref block: (TB, Fe) f32 ; acc f32 scratch.
    k = pl.program_id(1)

    @pl.when(k == 0)
    def _init():
        acc_ref[...] = jnp.zeros_like(acc_ref)

    x = seq_ref[...]
    if mask_tail:
        # The last S-chunk may extend past the true sequence length; zero out
        # the out-of-range rows (their contents are unspecified) before summing.
        row = jax.lax.broadcasted_iota(jnp.int32, seq_ref.shape, 1)
        x = jnp.where(k * sc + row < s_total, x, jnp.zeros((), x.dtype))
    acc_ref[...] += jnp.sum(x, axis=1, dtype=jnp.float32)

    @pl.when(k == pl.num_programs(1) - 1)
    def _finalize():
        out_ref[...] = (acc_ref[...] * inv_len).astype(out_ref.dtype)


def stats_model_forward(seq, *, per_buffer_budget_bytes=None):
    """StatsModel.forward: mean over dim 1 of (B, S, F) -> (B, F)."""
    B, S, F = seq.shape
    assert S > 0, "sequence length must be positive"

    vmem_bytes, cores = _tpu_resources()
    if per_buffer_budget_bytes is None:
        # ~21 MiB/buffer on 128 MiB parts (v5e/v6e), ~10 MiB on v7x (64 MiB).
        per_buffer_budget_bytes = vmem_bytes // 6

    r, S_eff, F_eff = _fold_seq_into_lanes(S, F)
    seq_k = seq.reshape(B, S_eff, F_eff) if r > 1 else seq

    tb, sc, in_tile_bytes = _plan_tiles(
        B, S_eff, F_eff, seq.dtype, per_buffer_budget_bytes, cores)
    grid = (pl.cdiv(B, tb), pl.cdiv(S_eff, sc))
    mask_tail = (S_eff % sc) != 0

    # vmem_limit: 2x double-buffered input + 2x output + f32 accumulator +
    # headroom, capped well below the chip's physical VMEM.
    out_tile_bytes = _round_up(tb, 8) * _round_up(F_eff, 128) * 4
    need = 2 * in_tile_bytes + 3 * out_tile_bytes + (4 << 20)
    vmem_limit = int(min(max(need, 32 << 20), (vmem_bytes * 3) // 4))

    kernel = functools.partial(
        _mean_kernel, inv_len=1.0 / float(S), sc=sc, s_total=S_eff,
        mask_tail=mask_tail)

    # Note: per-step tiles here are sized to multi-MiB when possible, so the
    # default double-buffering already saturates HBM (pl.Buffered(3) skipped).
    out = pl.pallas_call(
        kernel,
        out_shape=jax.ShapeDtypeStruct((B, F_eff), jnp.float32),
        grid=grid,
        in_specs=[pl.BlockSpec((tb, sc, F_eff), lambda b, k: (b, k, 0))],
        out_specs=pl.BlockSpec((tb, F_eff), lambda b, k: (b, 0)),
        scratch_shapes=[pltpu.VMEM((tb, F_eff), jnp.float32)],
        # TODO(synk): consider pltpu.CORE_PARALLEL on the batch axis for v7x
        # (2 TCs) once verified in a trace; plain "parallel" is the portable choice.
        compiler_params=pltpu.CompilerParams(
            dimension_semantics=("parallel", "arbitrary"),
            vmem_limit_bytes=vmem_limit,
        ),
    )(seq_k)

    if r > 1:
        # Fold the r lane-packed partial means back into F (tiny, done in f32).
        out = out.reshape(B, r, F).sum(axis=1)
    return out.astype(seq.dtype)


if __name__ == "__main__":
    key = jax.random.PRNGKey(0)
    k0, k1, k2 = jax.random.split(key, 3)

    # Primary demo shape (lane-fold path: F=32 -> r=4, last dim 128).
    B, S, F = 2, 8, 32
    seq = jax.random.normal(k0, (B, S, F), dtype=jnp.float32)
    out = jax.block_until_ready(stats_model_forward(seq))
    ref = jnp.mean(seq, axis=1)
    assert out.shape == (B, F), out.shape
    assert jnp.allclose(out, ref, atol=1e-5, rtol=1e-5), "mismatch (demo)"

    # Unaligned batch / feature dims (no lane fold possible, TB=8 aligned).
    seq2 = jax.random.normal(k1, (10, 7, 20), dtype=jnp.float32)
    out2 = jax.block_until_ready(stats_model_forward(seq2))
    assert jnp.allclose(out2, jnp.mean(seq2, axis=1), atol=1e-5, rtol=1e-5), \
        "mismatch (unaligned case)"

    # Exercise the S-chunked accumulator + masked-tail path by forcing a tiny
    # per-buffer VMEM budget.
    seq3 = jax.random.normal(k2, (2, 40, 256), dtype=jnp.float32)
    out3 = jax.block_until_ready(
        stats_model_forward(seq3, per_buffer_budget_bytes=32 * 1024))
    assert jnp.allclose(out3, jnp.mean(seq3, axis=1), atol=1e-5, rtol=1e-5), \
        "mismatch (S-chunked case)"

    print("KERNEL_OK")
</pallas_src>

<mosaic_0001>
module attributes {stable_mosaic.version = 11 : i64} {
  func.func @_mean_kernel(%arg0: i32, %arg1: i32, %arg2: memref<2x2x128xf32, #tpu.memory_space<vmem>>, %arg3: memref<2x128xf32, #tpu.memory_space<vmem>>, %arg4: memref<2x128xf32, #tpu.memory_space<vmem>>) attributes {dimension_semantics = [#tpu.dimension_semantics<parallel>, #tpu.dimension_semantics<arbitrary>], iteration_bounds = array<i64: 1, 1>, scalar_prefetch = 0 : i64, scratch_operands = 1 : i64, tpu.core_type = #tpu.core_type<tc>, window_params = [{transform_indices = @transform_0, window_bounds = array<i64: 2, 2, 128>}, {transform_indices = @transform_1, window_bounds = array<i64: 2, 128>}]} {
    %c0_i32 = arith.constant 0 : i32
    %0 = arith.cmpi eq, %arg1, %c0_i32 : i32
    %1 = arith.extui %0 : i1 to i32
    %c0_i32_0 = arith.constant 0 : i32
    %2 = arith.cmpi ne, %1, %c0_i32_0 : i32
    scf.if %2 {
      %cst_9 = arith.constant 0.000000e+00 : f32
      %11 = vector.broadcast %cst_9 : f32 to vector<2x128xf32>
      %c0_10 = arith.constant 0 : index
      %c0_11 = arith.constant 0 : index
      %12 = vector.load %arg4[%c0_10, %c0_11] : memref<2x128xf32, #tpu.memory_space<vmem>>, vector<2x128xf32>
      tpu.vector_store %arg4[%c0_10, %c0_11], %11 {strides = array<i32>} : memref<2x128xf32, #tpu.memory_space<vmem>>, vector<2x128xf32>,
    } else {
    }
    %c0 = arith.constant 0 : index
    %c0_1 = arith.constant 0 : index
    %c0_2 = arith.constant 0 : index
    %3 = vector.load %arg2[%c0, %c0_1, %c0_2] : memref<2x2x128xf32, #tpu.memory_space<vmem>>, vector<2x2x128xf32>
    %c0_3 = arith.constant 0 : index
    %c0_4 = arith.constant 0 : index
    %4 = vector.load %arg4[%c0_3, %c0_4] : memref<2x128xf32, #tpu.memory_space<vmem>>, vector<2x128xf32>
    %cst = arith.constant dense<0.000000e+00> : vector<2x128xf32>
    %5 = vector.multi_reduction <add>, %3, %cst [1] : vector<2x2x128xf32> to vector<2x128xf32>
    %6 = arith.addf %4, %5 : vector<2x128xf32>
    %c0_5 = arith.constant 0 : index
    %c0_6 = arith.constant 0 : index
    %7 = vector.load %arg4[%c0_5, %c0_6] : memref<2x128xf32, #tpu.memory_space<vmem>>, vector<2x128xf32>
    tpu.vector_store %arg4[%c0_5, %c0_6], %6 {strides = array<i32>} : memref<2x128xf32, #tpu.memory_space<vmem>>, vector<2x128xf32>,
    %c0_i32_7 = arith.constant 0 : i32
    %8 = arith.cmpi eq, %arg1, %c0_i32_7 : i32
    %9 = arith.extui %8 : i1 to i32
    %c0_i32_8 = arith.constant 0 : i32
    %10 = arith.cmpi ne, %9, %c0_i32_8 : i32
    scf.if %10 {
      %c0_9 = arith.constant 0 : index
      %c0_10 = arith.constant 0 : index
      %11 = vector.load %arg4[%c0_9, %c0_10] : memref<2x128xf32, #tpu.memory_space<vmem>>, vector<2x128xf32>
      %cst_11 = arith.constant 1.250000e-01 : f32
      %12 = vector.broadcast %cst_11 : f32 to vector<2x128xf32>
      %13 = arith.mulf %11, %12 : vector<2x128xf32>
      %c0_12 = arith.constant 0 : index
      %c0_13 = arith.constant 0 : index
      %14 = vector.load %arg3[%c0_12, %c0_13] : memref<2x128xf32, #tpu.memory_space<vmem>>, vector<2x128xf32>
      tpu.vector_store %arg3[%c0_12, %c0_13], %13 {strides = array<i32>} : memref<2x128xf32, #tpu.memory_space<vmem>>, vector<2x128xf32>,
    } else {
    }
    return
  }
  func.func @transform_0(%arg0: i32, %arg1: i32) -> (i32, i32, i32) {
    %c0_i32 = arith.constant 0 : i32
    %c0_i32_0 = arith.constant 0 : i32
    return %arg0, %arg1, %c0_i32 : i32, i32, i32
  }
  func.func @transform_1(%arg0: i32, %arg1: i32) -> (i32, i32) {
    %c0_i32 = arith.constant 0 : i32
    %c0_i32_0 = arith.constant 0 : i32
    return %arg0, %c0_i32 : i32, i32
  }
}

</mosaic_0001>

<bundles_post_ra>
// kernel: tpu_custom_call.1
= control target key start
LH: loop header
LB: loop body
LE: loop exit
PB: predicated region body
PF: predicated region fallthrough
CT: control target
= control target key end

     0   :  { %6 = vsyncpa [#allocation4], 0  ;;  %s166_s0 = inlined_call_operand.hbm [shape: f32[2,2,128], index: 0, kind: input, shape index: {}]   ;;  %s167_s1 = inlined_call_operand.hbm [shape: f32[2,128], index: 1, kind: output, shape index: {}]  }
   0x1   :  { %7 = vsyncpa [#allocation5], 0  ;;  %s127_s6 = smov [#allocation3]   ;;  %s79_s10 = scalar_lea.hbm %s166_s0, 64 }
   0x2   :  { %s13_s7 = sshll.u32 %s127_s6, 4  ;;  %p80_p0 = scmp.ne.s32.totalorder %s166_s0, %s79_s10  ;;  %s14_s7 = int_to_ptr.vmem [resolvable:$true] %s13_s7 }
   0x3   :  { %p83_p1 = scmp.lt.u32.totalorder %s79_s10, %s166_s0 }
   0x5   :  { %p85_p2 = pnand %p83_p1, %p80_p0 }
   0x7   :  { %88 = shalt.err (!%p85_p2)
}
   0x8   :  { %s89_s15 = scalar_lea.vmem %s14_s7, 64  ;;  %p94_p4 = scmp.lt.s32.totalorder %s14_s7, %s14_s7 }
   0x9   :  { %p90_p3 = scmp.ne.s32.totalorder %s14_s7, %s89_s15  ;;  %p95_p5 = scmp.lt.s32.totalorder %s89_s15, %s89_s15 }
   0xb   :  { %p96_p6 = por %p95_p5, %p94_p4 }
   0xd   :  { %p97_p7 = pnand %p96_p6, %p90_p3 }
   0xf   :  { %100 = shalt.err (!%p97_p7)
}
  0x10   :  { %s128_s16 = smov 32   ;;  %s129_s17 = smov 2  }
  0x11   :  { %19 = dma.hbm_to_vmem [thread:$0]  %s166_s0, 64, %s14_s7, [#allocation4], %s128_s16, %s128_s16, %s129_s17  }
  0x12   :  { %123 = dma.done.wait [#allocation4], 64  }
  0x13   :  { %124 = vsyncadd [#allocation4], 4294967232  ;;  %v130_v0 = vmov 0.0   ;;  %vm31_vm0 = vcmask 1041408   ;;  %v28_v1 = vld [vmem:[#allocation3] sm:$0x3] }
  0x14   :  { %27 = vst [vmem:[#allocation2] sm:$0x3] %v130_v0  ;;  %v29_v2 = vld [vmem:[#allocation3 + $0x2] sm:$0x3]  ;;  %v32_v3 = vsel %vm31_vm0, %v28_v1, 0.0  ;;  %vm48_vm1 = vcmask 1041409  }
  0x15   :  { %v39_v4 = vsel %vm31_vm0, %v29_v2, 0.0  ;;  %v33_v5 = vrot.slane %v32_v3, 4  ;;  %s131_s0 = smov [#allocation6]  }
  0x16   :  { %v40_v6 = vrot.slane %v39_v4, 4  ;;  %s65_s20 = sshll.u32 %s131_s0, 4  ;;  %s66_s20 = int_to_ptr.vmem [resolvable:$true] %s65_s20 }
  0x17   :  { %v34_v7 = vadd.f32 %v33_v5, %v32_v3  ;;  %s101_s21 = scalar_lea.vmem %s66_s20, 32  ;;  %p106_p9 = scmp.lt.s32.totalorder %s66_s20, %s66_s20 }
  0x18   :  { %v41_v8 = vadd.f32 %v40_v6, %v39_v4  ;;  %p102_p8 = scmp.ne.s32.totalorder %s66_s20, %s101_s21  ;;  %p107_p10 = scmp.lt.s32.totalorder %s101_s21, %s101_s21 }
  0x19   :  { %v35_v9 = vrot.slane %v34_v7, 2 }
  0x1a   :  { %v42_v10 = vrot.slane %v41_v8, 2  ;;  %p108_p11 = por %p107_p10, %p106_p9 }
  0x1b   :  { %v36_v11 = vadd.f32 %v35_v9, %v34_v7  ;;  %v30_v15 = vld [vmem:[#allocation2] sm:$0x3] }
  0x1c   :  { %v43_v12 = vadd.f32 %v42_v10, %v41_v8  ;;  %p109_p12 = pnand %p108_p11, %p102_p8 }
  0x1d   :  { %v37_v13 = vrot.slane %v36_v11, 1 }
  0x1e   :  { %v44_v14 = vrot.slane %v43_v12, 1 }
  0x1f   :  { %v38_v16 = vadd.f32 %v37_v13, %v36_v11 }
  0x20   :  { %v45_v17 = vadd.f32 %v44_v14, %v43_v12 }
  0x22   :  { %v49_v18 = vsel %vm48_vm1, %v45_v17, %v38_v16 }
  0x23   :  { %v51_v19 = vadd.f32 %v49_v18, %v30_v15 }
  0x25   :  { %52 = vst [vmem:[#allocation2] sm:$0x3] %v51_v19 }
  0x2c   :  { %v56_v20 = vld [vmem:[#allocation2] sm:$0x3] }
  0x2d   :  { %v57_v21 = vmul.f32 0.125, %v56_v20 }
  0x2f   :  { %58 = vst [vmem:[#allocation6] sm:$0x3] %v57_v21 }
  0x30   :  { %112 = shalt.err (!%p109_p12)
}
  0x31   :  { %s113_s24 = scalar_lea.hbm %s167_s1, 32 }
  0x32   :  { %p114_p13 = scmp.ne.s32.totalorder %s167_s1, %s113_s24  ;;  %p117_p0 = scmp.lt.u32.totalorder %s113_s24, %s167_s1 }
  0x34   :  { %p119_p1 = pnand %p117_p0, %p114_p13 }
  0x36   :  { %122 = shalt.err (!%p119_p1)
}
  0x37   :  { %68 = dma.vmem_to_hbm [thread:$0]  %s66_s20, 32, %s167_s1, [#allocation5]  }
  0x38   :  { %125 = dma.done.wait [#allocation5], 32  }
  0x39   :  { %126 = vsyncadd [#allocation5], 4294967264 }
  0x3a   :  { %72 = vsyncpa [#allocation4], 1 }
  0x3b   :  { %73 = vsyncpa [#allocation5], 1 }

</bundles_post_ra>
